<compile_context>
chip_gen: v6e
topology: v6e:2x2x1
jax: 0.10.0
libtpu: 0.0.40
codegen_flags: <defaults>
</compile_context>

<pallas_src>
import functools

import jax
import jax.numpy as jnp
from jax.experimental import pallas as pl
from jax.experimental.pallas import tpu as pltpu

EPS = 1e-5


def _round_up(a, b):
    return (a + b - 1) // b * b


# ---------------------------------------------------------------------------
# Kernel: BatchNorm1d over a (channel_block, N*T) slab
# ---------------------------------------------------------------------------
def _bn_kernel(x_ref, p_ref, o_ref, *, training, inv_count, eps):
    x = x_ref[...]                              # (cb, N*T) f32
    p = p_ref[...]                              # (cb, 8): [gamma, beta, r_mean, r_var, 0...]
    gamma = p[:, 0:1]
    beta = p[:, 1:2]
    if training:
        # batch statistics over the fused N*T lane axis (biased variance),
        # exactly what torch BatchNorm1d uses to normalize in training mode.
        mean = jnp.sum(x, axis=1, keepdims=True) * inv_count
        xc = x - mean
        var = jnp.sum(xc * xc, axis=1, keepdims=True) * inv_count
    else:
        xc = x - p[:, 2:3]
        var = p[:, 3:4]
    o_ref[...] = xc * jax.lax.rsqrt(var + eps) * gamma + beta


# ---------------------------------------------------------------------------
# Forward wrapper
# ---------------------------------------------------------------------------
def norm_data_forward(x, gamma, beta, running_mean, running_var,
                      training=True, eps=EPS):
    """Forward of pyskl `norm_data`: BatchNorm1d(C*V) applied to (N, C, V, T)."""
    N, C, V, T = x.shape
    cflat = C * V
    nt = N * T

    # (N, C, V, T) -> (C*V, N*T): channels on sublanes, N*T dense on lanes.
    slab = jnp.transpose(x.astype(jnp.float32), (1, 2, 0, 3)).reshape(cflat, nt)

    # Channel-block tiling: >=2 blocks when possible (feeds both v7x TCs),
    # sublane-aligned (multiple of 8). Padded channels are zero and sliced off.
    if cflat > 8:
        cb = _round_up((cflat + 1) // 2, 8)
    else:
        cb = _round_up(cflat, 8)
    c_pad = _round_up(cflat, cb)
    n_blocks = c_pad // cb

    slab = jnp.pad(slab, ((0, c_pad - cflat), (0, 0)))

    # Pack all per-channel BN parameters into one small lane-contiguous operand.
    params = jnp.zeros((c_pad, 8), jnp.float32)
    params = params.at[:cflat, 0].set(gamma.astype(jnp.float32))
    params = params.at[:cflat, 1].set(beta.astype(jnp.float32))
    params = params.at[:cflat, 2].set(running_mean.astype(jnp.float32))
    params = params.at[:cflat, 3].set(running_var.astype(jnp.float32))
    params = params.at[cflat:, 3].set(1.0)      # benign variance for pad rows

    kernel = functools.partial(_bn_kernel, training=training,
                               inv_count=1.0 / nt, eps=eps)

    # TODO(synk): for very large N*T the lane axis should additionally be tiled
    # with a reduction grid axis + partial-moment accumulators; at pyskl-scale
    # shapes one lane block per channel tile fits VMEM easily.
    y_slab = pl.pallas_call(
        kernel,
        grid=(n_blocks,),
        in_specs=[
            pl.BlockSpec((cb, nt), lambda i: (i, 0)),   # activations
            pl.BlockSpec((cb, 8), lambda i: (i, 0)),    # packed BN parameters
        ],
        out_specs=pl.BlockSpec((cb, nt), lambda i: (i, 0)),
        out_shape=jax.ShapeDtypeStruct((c_pad, nt), jnp.float32),
        compiler_params=pltpu.CompilerParams(dimension_semantics=("parallel",)),
    )(slab, params)

    # (C*V, N*T) -> (N, C, V, T)
    y = y_slab[:cflat].reshape(C, V, N, T)
    return jnp.transpose(y, (2, 0, 1, 3))


# ---------------------------------------------------------------------------
# Pure-JAX reference (for correctness checking)
# ---------------------------------------------------------------------------
def _norm_data_ref(x, gamma, beta, running_mean, running_var, training, eps=EPS):
    N, C, V, T = x.shape
    xf = x.reshape(N, C * V, T).astype(jnp.float32)
    if training:
        mean = xf.mean(axis=(0, 2))
        var = xf.var(axis=(0, 2))               # biased, as torch BN uses in fwd
    else:
        mean, var = running_mean, running_var
    y = (xf - mean[None, :, None]) * jax.lax.rsqrt(var[None, :, None] + eps)
    y = y * gamma[None, :, None] + beta[None, :, None]
    return y.reshape(N, C, V, T)


if __name__ == "__main__":
    # norm_data defaults: norm_channels=3, num_node=25; T=128 keeps N*T lane-dense.
    N, C, V, T = 2, 3, 25, 128
    key = jax.random.PRNGKey(0)
    x = jax.random.normal(key, (N, C, V, T), jnp.float32)

    cflat = C * V
    gamma = jnp.ones((cflat,), jnp.float32)           # nn.BatchNorm1d init
    beta = jnp.zeros((cflat,), jnp.float32)
    running_mean = jnp.zeros((cflat,), jnp.float32)
    running_var = jnp.ones((cflat,), jnp.float32)

    # Training-mode forward (default state of a freshly constructed nn.Module).
    y_tr = jax.block_until_ready(
        norm_data_forward(x, gamma, beta, running_mean, running_var, training=True))
    # Eval-mode forward (running statistics).
    y_ev = jax.block_until_ready(
        norm_data_forward(x, gamma, beta, running_mean, running_var, training=False))

    assert y_tr.shape == (N, C, V, T), y_tr.shape
    assert y_ev.shape == (N, C, V, T), y_ev.shape
    assert bool(jnp.all(jnp.isfinite(y_tr))) and bool(jnp.all(jnp.isfinite(y_ev)))

    ref_tr = _norm_data_ref(x, gamma, beta, running_mean, running_var, True)
    ref_ev = _norm_data_ref(x, gamma, beta, running_mean, running_var, False)
    assert jnp.allclose(y_tr, ref_tr, atol=1e-4, rtol=1e-4)
    assert jnp.allclose(y_ev, ref_ev, atol=1e-4, rtol=1e-4)

    print("KERNEL_OK")
</pallas_src>

<mosaic_0001>
module attributes {stable_mosaic.version = 11 : i64} {
  func.func @_bn_kernel(%arg0: i32, %arg1: memref<40x256xf32, #tpu.memory_space<vmem>>, %arg2: memref<40x8xf32, #tpu.memory_space<vmem>>, %arg3: memref<40x256xf32, #tpu.memory_space<vmem>>) attributes {dimension_semantics = [#tpu.dimension_semantics<parallel>], iteration_bounds = array<i64: 2>, scalar_prefetch = 0 : i64, scratch_operands = 0 : i64, tpu.core_type = #tpu.core_type<tc>, window_params = [{transform_indices = @transform_0, window_bounds = array<i64: 40, 256>}, {transform_indices = @transform_1, window_bounds = array<i64: 40, 8>}, {transform_indices = @transform_2, window_bounds = array<i64: 40, 256>}]} {
    %c0 = arith.constant 0 : index
    %c0_0 = arith.constant 0 : index
    %0 = vector.load %arg1[%c0, %c0_0] : memref<40x256xf32, #tpu.memory_space<vmem>>, vector<40x256xf32>
    %c0_1 = arith.constant 0 : index
    %c0_2 = arith.constant 0 : index
    %1 = vector.load %arg2[%c0_1, %c0_2] : memref<40x8xf32, #tpu.memory_space<vmem>>, vector<40x8xf32>
    %2 = vector.extract_strided_slice %1 {offsets = [0, 0], sizes = [40, 1], strides = [1, 1]} : vector<40x8xf32> to vector<40x1xf32>
    %3 = vector.extract_strided_slice %1 {offsets = [0, 1], sizes = [40, 1], strides = [1, 1]} : vector<40x8xf32> to vector<40x1xf32>
    %cst = arith.constant dense<0.000000e+00> : vector<40xf32>
    %4 = vector.multi_reduction <add>, %0, %cst [1] : vector<40x256xf32> to vector<40xf32>
    %5 = vector.shape_cast %4 : vector<40xf32> to vector<40x1xf32>
    %cst_3 = arith.constant 3.906250e-03 : f32
    %6 = vector.broadcast %cst_3 : f32 to vector<40x1xf32>
    %7 = arith.mulf %5, %6 : vector<40x1xf32>
    %8 = vector.broadcast %7 : vector<40x1xf32> to vector<40x256xf32>
    %9 = arith.subf %0, %8 : vector<40x256xf32>
    %10 = arith.mulf %9, %9 : vector<40x256xf32>
    %cst_4 = arith.constant dense<0.000000e+00> : vector<40xf32>
    %11 = vector.multi_reduction <add>, %10, %cst_4 [1] : vector<40x256xf32> to vector<40xf32>
    %12 = vector.shape_cast %11 : vector<40xf32> to vector<40x1xf32>
    %cst_5 = arith.constant 3.906250e-03 : f32
    %13 = vector.broadcast %cst_5 : f32 to vector<40x1xf32>
    %14 = arith.mulf %12, %13 : vector<40x1xf32>
    %cst_6 = arith.constant 9.99999974E-6 : f32
    %15 = vector.broadcast %cst_6 : f32 to vector<40x1xf32>
    %16 = arith.addf %14, %15 : vector<40x1xf32>
    %17 = math.rsqrt %16 : vector<40x1xf32>
    %18 = vector.broadcast %17 : vector<40x1xf32> to vector<40x256xf32>
    %19 = arith.mulf %9, %18 : vector<40x256xf32>
    %20 = vector.broadcast %2 : vector<40x1xf32> to vector<40x256xf32>
    %21 = arith.mulf %19, %20 : vector<40x256xf32>
    %22 = vector.broadcast %3 : vector<40x1xf32> to vector<40x256xf32>
    %23 = arith.addf %21, %22 : vector<40x256xf32>
    %c0_7 = arith.constant 0 : index
    %c0_8 = arith.constant 0 : index
    %24 = vector.load %arg3[%c0_7, %c0_8] : memref<40x256xf32, #tpu.memory_space<vmem>>, vector<40x256xf32>
    tpu.vector_store %arg3[%c0_7, %c0_8], %23 {strides = array<i32>} : memref<40x256xf32, #tpu.memory_space<vmem>>, vector<40x256xf32>,
    return
  }
  func.func @transform_0(%arg0: i32) -> (i32, i32) {
    %c0_i32 = arith.constant 0 : i32
    %c0_i32_0 = arith.constant 0 : i32
    return %arg0, %c0_i32 : i32, i32
  }
  func.func @transform_1(%arg0: i32) -> (i32, i32) {
    %c0_i32 = arith.constant 0 : i32
    %c0_i32_0 = arith.constant 0 : i32
    return %arg0, %c0_i32 : i32, i32
  }
  func.func @transform_2(%arg0: i32) -> (i32, i32) {
    %c0_i32 = arith.constant 0 : i32
    %c0_i32_0 = arith.constant 0 : i32
    return %arg0, %c0_i32 : i32, i32
  }
}

</mosaic_0001>

<bundles_post_ra>
// kernel: tpu_custom_call.1
= control target key start
LH: loop header
LB: loop body
LE: loop exit
PB: predicated region body
PF: predicated region fallthrough
CT: control target
= control target key end

     0   :  { %7 = vsyncpa [#allocation3], 0  ;;  %s882_s0 = inlined_call_operand.hbm [shape: f32[80,256], index: 0, kind: input, shape index: {}]   ;;  %s883_s1 = inlined_call_operand.vmem [shape: f32[80,8], index: 1, kind: input, shape index: {}]   ;;  %s884_s2 = inlined_call_operand.hbm [shape: f32[80,256], index: 2, kind: output, shape index: {}]  }
   0x1   :  { %9 = vsyncpa [#allocation3 + $0x1], 0 }
   0x2   :  { %10 = vsyncpa [#allocation4], 0 }
   0x3   :  { %12 = vsyncpa [#allocation4 + $0x1], 0  ;;  %s659_s9 = smov 0   ;;  %s661_s10 = smov 0  }
   0x4   :  { %s663_s11 = smov 0   ;;  %s665_s12 = smov 0  }
   0x5 LB: > { %s680_s13 = sadd.s32 4294967295, %s634_s12   ;;  %s457_s14 = sadd.s32 4294967294, %s634_s12   ;;  %s634_s12 = sphi %s665_s12, %s898_s12   ;;  %s630_s11 = sphi %s663_s11, %s897_s11   ;;  %s626_s10 = sphi %s661_s10, %s896_s10   ;;  %s622_s9 = sphi %s659_s9, %s895_s9  }
   0x6   : > { %s684_s15 = sadd.s32 1, %s634_s12   ;;  %s25_s16 = sadd.s32 1, %s630_s11 }
   0x7   : > { %s22_s17 = ssub.s32 %s634_s12, %s684_s15  ;;  %p32_p0 = scmp.ne.s32.totalorder %s630_s11, %s626_s10 }
   0x8   : > { %p23_p1 = scmp.eq.s32.totalorder %s22_s17, 0  ;;  %p33_p2 = scmp.eq.s32.totalorder %s634_s12, 0 }
   0x9   : > { %p38_p3 = scmp.ne.s32.totalorder %s626_s10, %s622_s9  ;;  %p39_p4 = scmp.eq.s32.totalorder %s680_s13, 0 }
   0xa   : > { %s696_s18 = scalar_select %p23_p1, %s630_s11, %s25_s16  }
   0xb   : > { %p34_p5 = por %p33_p2, %p32_p0  ;;  %p698_p6 = por %p39_p4, %p38_p3 }
   0xc   : > { %p88_p7 = scmp.eq.s32.totalorder %s680_s13, 1  ;;  %p94_p8 = scmp.eq.s32.totalorder %s457_s14, 1 }
   0xd   : > { %s887_s19 = scalar_select %p698_p6, 1, 0 }
   0xe   : > { %p488_p10 = scmp.lt.s32.totalorder %s634_s12, 2  ;;  %p705_p11 = por %p88_p7, %p32_p0 }
   0xf   : > { %p709_p12 = por %p94_p8, %p38_p3  ;;  %s114_s22 = sand.u32 1, %s630_s11  }
  0x10   : > { %s888_s20 = scalar_select %p705_p11, 1, 0 }
  0x11   : > { %s889_s21 = scalar_select %p709_p12, 1, 0 }
  0x12   : > { %s472_s23 = smul.u32 1280, %s634_s12  ;;  %p720_p13 = pnand %p488_p10, %p34_p5 }
  0x13   : > { %s474_s24 = smul.u32 80, %s114_s22  ;;  %s726_s3 = scalar_lea.sflag [#allocation3], %s114_s22 }
  0x14   : > { %s718_s27 = scalar_lea.hbm %s882_s0, %s472_s23  ;;  %p544_p1 = pneg %p720_p13 }
  0x15   : > { %s118_s29 = scalar_lea.vmem [#allocation2], %s474_s24  ;;  %s542_s4 = scalar_lea.hbm %s718_s27, 1280 }
  0x16   : > { %s126_s30 = sshll.u32 %s118_s29, 4  ;;  %p543_p0 = scmp.ne.s32.totalorder %s718_s27, %s542_s4  ;;  %s724_s30 = int_to_ptr.vmem [resolvable:$true] %s126_s30 }
  0x17   : > { %s547_s7 = scalar_lea.hbm %s882_s0, 2560  ;;  %p548_p4 = scmp.lt.s32.totalorder %s718_s27, %s882_s0 }
  0x18   : > { %p545_p2 = pnand %p544_p1, %p543_p0  ;;  %p549_p5 = scmp.lt.s32.totalorder %s547_s7, %s542_s4 }
  0x1a   : > { %p546_p3 = pneg %p545_p2  ;;  %p550_p7 = por %p549_p5, %p548_p4 }
  0x1c   : > { %p551_p8 = pnand %p550_p7, %p546_p3 }
  0x1e   : > { %554 = shalt.err (!%p551_p8)
}
  0x1f   : > { %s555_s16 = scalar_lea.vmem %s724_s30, 1280  ;;  %s636_s17 = smov [#allocation2]  }
  0x20   : > { %p556_p10 = scmp.ne.s32.totalorder %s724_s30, %s555_s16  ;;  %s560_s22 = sshll.u32 %s636_s17, 4  ;;  %s561_s22 = int_to_ptr.vmem [resolvable:$false] %s560_s22 }
  0x21   : > { %s562_s23 = scalar_lea.vmem %s561_s22, 2560  ;;  %p563_p2 = scmp.lt.s32.totalorder %s724_s30, %s561_s22 }
  0x22   : > { %p558_p9 = pnand %p556_p10, %p544_p1  ;;  %p564_p12 = scmp.lt.s32.totalorder %s562_s23, %s555_s16 }
  0x24   : > { %p559_p0 = pneg %p558_p9  ;;  %p565_p11 = por %p564_p12, %p563_p2 }
  0x26   : > { %p566_p6 = pnand %p565_p11, %p559_p0 }
  0x28   : > { %569 = shalt.err (!%p566_p6)
}
  0x29   : > { %s637_s24 = smov 256   ;;  %s638_s25 = smov 16  }
  0x2a   : > { %483 = dma.hbm_to_vmem [thread:$0]  (!%p720_p13), %s718_s27, 1280, %s724_s30, %s726_s3, %s637_s24, %s637_s24, %s638_s25  }
  0x2b   : > { %p462_p9 = scmp.ge.s32.totalorder %s634_s12, 1  ;;  %p143_p1 = scmp.lt.s32.totalorder %s634_s12, 3 }
  0x2d   : > { %p144_p3 = pnand %p462_p9, %p143_p1 }
  0x2e   : > { %s750_s26 = sand.u32 (!%p144_p3), 1, %s626_s10   ;;  %p891_p6 = scmp.ne.s32.totalorder (!%p144_p3), %s887_s19, 0 }
  0x2f   : > { %147 = sbr.rel (%p144_p3) target bundleno = 387 (0x183), region = 28  ;;  %s150_s4 = scalar_lea.sflag (!%p144_p3), [#allocation3], %s750_s26 }
  0x30   : > { %s475_s29 = smul.u32 (!%p144_p3), 80, %s750_s26 }
  0x32   : > { %s153_s5 = scalar_lea.vmem (!%p144_p3), [#allocation2], %s475_s29 }
  0x34   : > { %613 = dma.done.wait (%p891_p6), %s150_s4, 1280  }
  0x35   : > { %615 = vsyncadd (%p891_p6), %s150_s4, 4294966016  ;;  %v639_v0 = vmov 0   ;;  %v187_v1 = vld [vmem:[%s153_s5] sm:$0xff]  ;;  %v188_v2 = vld [vmem:[%s153_s5 + $0x8] sm:$0xff]  ;;  %s180_s19 = smul.u32 5, %s680_s13  ;;  %v640_v21 = vmov 1  }
  0x36   : > { %529 = vset.pattern.permute.xlu1 %v639_v0  ;;  %528 = vset.pattern.permute.xlu0 %v639_v0  ;;  %v191_v3 = vld [vmem:[%s153_s5 + $0x20] sm:$0xff]  ;;  %v202_v4 = vadd.f32 %v188_v2, %v187_v1  ;;  %v192_v5 = vld [vmem:[%s153_s5 + $0x28] sm:$0xff]  ;;  %v189_v6 = vld [vmem:[%s153_s5 + $0x10] sm:$0xff]  ;;  %s814_s6 = scalar_lea.vmem [#allocation5], %s475_s29  ;;  %s473_s7 = smul.u32 1280, %s680_s13 }
  0x37   : > { %v190_v7 = vld [vmem:[%s153_s5 + $0x18] sm:$0xff]  ;;  %v208_v8 = vadd.f32 %v192_v5, %v191_v3  ;;  %v193_v9 = vld [vmem:[%s153_s5 + $0x30] sm:$0xff]  ;;  %v195_v13 = vld [vmem:[%s153_s5 + $0x40] sm:$0xff]  ;;  %p181_p11 = scmp.lt.s32.totalorder %s180_s19, 9  ;;  %s372_s8 = sshll.u32 %s814_s6, 4  ;;  %s835_s8 = int_to_ptr.vmem [resolvable:$true] %s372_s8 }
  0x38   : > { %v194_v10 = vld [vmem:[%s153_s5 + $0x38] sm:$0xff]  ;;  %203 = vadd.xlane.f32.xlu0 %v202_v4  ;;  %v205_v11 = vadd.f32 %v190_v7, %v189_v6  ;;  %v196_v14 = vld [vmem:[%s153_s5 + $0x48] sm:$0xff]  ;;  %s833_s16 = scalar_lea.hbm %s884_s2, %s473_s7  ;;  %s358_s17 = scalar_lea.sflag [#allocation4], %s750_s26 }
  0x39   : > { %209 = vadd.xlane.f32.xlu1 %v208_v8  ;;  %v211_v12 = vadd.f32 %v194_v10, %v193_v9  ;;  %v214_v15 = vadd.f32 %v196_v14, %v195_v13  ;;  %s900_s19 = smov (!%p181_p11, %s180_s19), 9  ;;  %s570_s22 = scalar_lea.vmem %s835_s8, 1280 }
  0x3a   : > { %s463_s27 = sshll.u32 %s900_s19, 3  ;;  %p571_p12 = scmp.ne.s32.totalorder %s835_s8, %s570_s22 }
  0x3b   : > { %s184_s3 = scalar_lea.vmem %s883_s1, %s463_s27  ;;  %p892_p13 = scmp.ne.s32.totalorder %s888_s20, 0 }
  0x3c   : > { %206 = vadd.xlane.f32.xlu0 %v205_v11  ;;  %v198_v16 = vld [vmem:[%s184_s3 + $0x8] sm:$0xff]  ;;  %v199_v17 = vld [vmem:[%s184_s3 + $0x10] sm:$0xff]  ;;  %v200_v18 = vld [vmem:[%s184_s3 + $0x18] sm:$0xff]  ;;  %s641_s23 = smov [#allocation5]  }
  0x3d   : > { %212 = vadd.xlane.f32.xlu1 %v211_v12  ;;  %v197_v19 = vld [vmem:[%s184_s3] sm:$0xff]  ;;  %p572_p4 = pnand %p571_p12, %p892_p13  ;;  %s574_s24 = sshll.u32 %s641_s23, 4  ;;  %s575_s24 = int_to_ptr.vmem [resolvable:$false] %s574_s24 }
  0x3e   : > { %v201_v20 = vld [vmem:[%s184_s3 + $0x20] sm:$0xff]  ;;  %s576_s25 = scalar_lea.vmem %s575_s24, 2560  ;;  %p577_p7 = scmp.lt.s32.totalorder %s835_s8, %s575_s24 }
  0x3f   : > { %p573_p5 = pneg %p572_p4  ;;  %p578_p8 = scmp.lt.s32.totalorder %s576_s25, %s570_s22 }
  0x40   : > { %215 = vadd.xlane.f32.xlu0 %v214_v15 }
  0x41   : > { %p579_p10 = por %p578_p8, %p577_p7 }
  0x43   : > { %p580_p0 = pnand %p579_p10, %p573_p5 }
  0x4e   : > { %289 = vperm.xlu1 %529, %v198_v16  }
  0x52   : > { %294 = vperm.xlu1 %529, %v199_v17  }
  0x56   : > { %299 = vperm.xlu1 %529, %v200_v18   ;;  %284 = vperm.xlu0 %528, %v197_v19  }
  0x5a   : > { %304 = vperm.xlu1 %529, %v201_v20   ;;  %531 = vset.pattern.permute.xlu0 %v640_v21 }
  0x5e   : > { %530 = vset.pattern.permute.xlu1 %v640_v21 }
  0x5f   : > { %318 = vperm.xlu1 %530, %v197_v19  }
  0x63   : > { %322 = vperm.xlu1 %530, %v198_v16  }
  0x67   : > { %326 = vperm.xlu1 %530, %v199_v17  }
  0xc1   : > { %v204_v22 = vpop.xlane.xlu0 %203 }
  0xc2   : > { %v217_v23 = vmul.f32 0.00390625, %v204_v22  ;;  %v210_v24 = vpop.xlane.xlu1 %209 }
  0xc3   : > { %v219_v25 = vmul.f32 0.00390625, %v210_v24 }
  0xc4   : > { %v764_v26 = vsub.f32 %v187_v1, %v217_v23  ;;  %v766_v27 = vsub.f32 %v188_v2, %v217_v23 }
  0xc5   : > { %v768_v28 = vsub.f32 %v191_v3, %v219_v25  ;;  %v770_v29 = vsub.f32 %v192_v5, %v219_v25  ;;  %v207_v30 = vpop.xlane.xlu0 %206 }
  0xc6   : > { %v218_v31 = vmul.f32 0.00390625, %v207_v30  ;;  %v213_v32 = vpop.xlane.xlu1 %212  ;;  %v232_v33 = vmul.f32 %v764_v26, %v764_v26  ;;  %v233_v34 = vmul.f32 %v766_v27, %v766_v27 }
  0xc7   : > { %v220_v35 = vmul.f32 0.00390625, %v213_v32  ;;  %v236_v36 = vmul.f32 %v768_v28, %v768_v28  ;;  %v237_v37 = vmul.f32 %v770_v29, %v770_v29 }
  0xc8   : > { %v780_v38 = vsub.f32 %v189_v6, %v218_v31  ;;  %v782_v39 = vsub.f32 %v190_v7, %v218_v31  ;;  %v242_v40 = vadd.f32 %v233_v34, %v232_v33 }
  0xc9   : > { %v784_v41 = vsub.f32 %v193_v9, %v220_v35  ;;  %v786_v42 = vsub.f32 %v194_v10, %v220_v35  ;;  %v216_v43 = vpop.xlane.xlu0 %215  ;;  %v248_v45 = vadd.f32 %v237_v37, %v236_v36 }
  0xca   : > { %v221_v44 = vmul.f32 0.00390625, %v216_v43  ;;  %243 = vadd.xlane.f32.xlu1 %v242_v40  ;;  %v234_v46 = vmul.f32 %v780_v38, %v780_v38  ;;  %v235_v47 = vmul.f32 %v782_v39, %v782_v39  ;;  %v290_v57 = vpop.permute.xlu1 %289 }
  0xcb   : > { %v238_v48 = vmul.f32 %v784_v41, %v784_v41  ;;  %v239_v49 = vmul.f32 %v786_v42, %v786_v42 }
  0xcc   : > { %v796_v50 = vsub.f32 %v195_v13, %v221_v44  ;;  %v798_v51 = vsub.f32 %v196_v14, %v221_v44  ;;  %v245_v52 = vadd.f32 %v235_v47, %v234_v46 }
  0xcd   : > { %v251_v53 = vadd.f32 %v239_v49, %v238_v48 }
  0xce   : > { %249 = vadd.xlane.f32.xlu1 %v248_v45  ;;  %246 = vadd.xlane.f32.xlu0 %v245_v52  ;;  %v240_v54 = vmul.f32 %v796_v50, %v796_v50  ;;  %v241_v55 = vmul.f32 %v798_v51, %v798_v51  ;;  %v295_v58 = vpop.permute.xlu1 %294 }
  0xd0   : > { %v254_v56 = vadd.f32 %v241_v55, %v240_v54 }
  0xd1   : > { %v285_v0 = vpop.permute.xlu0 %284 }
  0xd2   : > { %252 = vadd.xlane.f32.xlu0 %v251_v53  ;;  %255 = vadd.xlane.f32.xlu1 %v254_v56  ;;  %v804_v59 = vpop.permute.xlu1 %299 }
  0xd6   : > { %v305_v60 = vpop.permute.xlu1 %304 }
  0xda   : > { %v319_v61 = vpop.permute.xlu1 %318 }
  0xde   : > { %v323_v62 = vpop.permute.xlu1 %322 }
  0xe2   : > { %v327_v63 = vpop.permute.xlu1 %326 }
  0xe3   : > { %330 = vperm.xlu1 %530, %v200_v18  }
  0xe8   : > { %334 = vperm.xlu0 %531, %v201_v20  }
 0x153   : > { %v244_v1 = vpop.xlane.xlu1 %243 }
 0x154   : > { %v257_v2 = vmul.f32 0.00390625, %v244_v1 }
 0x156   : > { %v262_v3 = vadd.f32 1e-05, %v257_v2 }
 0x157   : > { %v250_v4 = vpop.xlane.xlu1 %249  ;;  %v247_v5 = vpop.xlane.xlu0 %246 }
 0x158   : > { %532 = vrsqrt.f32 %v262_v3  ;;  %v259_v6 = vmul.f32 0.00390625, %v250_v4  ;;  %v258_v7 = vmul.f32 0.00390625, %v247_v5 }
 0x15a   : > { %v264_v8 = vadd.f32 1e-05, %v259_v6  ;;  %v263_v9 = vadd.f32 1e-05, %v258_v7 }
 0x15b   : > { %v256_v10 = vpop.xlane.xlu1 %255  ;;  %v253_v11 = vpop.xlane.xlu0 %252 }
 0x15c   : > { %534 = vrsqrt.f32 %v264_v8  ;;  %v261_v12 = vmul.f32 0.00390625, %v256_v10  ;;  %v260_v13 = vmul.f32 0.00390625, %v253_v11 }
 0x15d   : > { %536 = vrsqrt.f32 %v263_v9 }
 0x15e   : > { %v266_v14 = vadd.f32 1e-05, %v261_v12  ;;  %v265_v15 = vadd.f32 1e-05, %v260_v13 }
 0x15f   : > { %v331_v49 = vpop.permute.xlu1 %330 }
 0x160   : > { %538 = vrsqrt.f32 %v266_v14 }
 0x161   : > { %540 = vrsqrt.f32 %v265_v15 }
 0x163   : > { %v335_v45 = vpop.permute.xlu0 %334 }
 0x165   : > { %v533_v16 = vpop.eup %532 }
 0x166   : > { %v272_v17 = vmul.f32 %v533_v16, %v764_v26  ;;  %v273_v18 = vmul.f32 %v533_v16, %v766_v27 }
 0x168   : > { %v307_v19 = vmul.f32 %v285_v0, %v272_v17  ;;  %v308_v20 = vmul.f32 %v285_v0, %v273_v18 }
 0x169   : > { %v535_v21 = vpop.eup %534 }
 0x16a   : > { %v537_v22 = vpop.eup %536  ;;  %v337_v23 = vadd.f32 %v319_v61, %v307_v19  ;;  %v338_v24 = vadd.f32 %v319_v61, %v308_v20  ;;  %v276_v25 = vmul.f32 %v535_v21, %v768_v28  ;;  %v277_v30 = vmul.f32 %v535_v21, %v770_v29 }
 0x16b   : > { %v274_v31 = vmul.f32 %v537_v22, %v780_v38  ;;  %v275_v32 = vmul.f32 %v537_v22, %v782_v39 }
 0x16c   : > { %347 = vst [vmem:[%s814_s6] sm:$0xff] %v337_v23  ;;  %348 = vst [vmem:[%s814_s6 + $0x8] sm:$0xff] %v338_v24  ;;  %v311_v26 = vmul.f32 %v295_v58, %v276_v25  ;;  %v312_v27 = vmul.f32 %v295_v58, %v277_v30 }
 0x16d   : > { %v539_v33 = vpop.eup %538  ;;  %v309_v28 = vmul.f32 %v290_v57, %v274_v31  ;;  %v310_v29 = vmul.f32 %v290_v57, %v275_v32 }
 0x16e   : > { %v541_v34 = vpop.eup %540  ;;  %v341_v35 = vadd.f32 %v327_v63, %v311_v26  ;;  %v342_v36 = vadd.f32 %v327_v63, %v312_v27  ;;  %v280_v37 = vmul.f32 %v539_v33, %v796_v50  ;;  %v281_v38 = vmul.f32 %v539_v33, %v798_v51 }
 0x16f   : > { %v339_v39 = vadd.f32 %v323_v62, %v309_v28  ;;  %v340_v40 = vadd.f32 %v323_v62, %v310_v29  ;;  %v278_v43 = vmul.f32 %v541_v34, %v784_v41  ;;  %v279_v44 = vmul.f32 %v541_v34, %v786_v42 }
 0x170   : > { %351 = vst [vmem:[%s814_s6 + $0x20] sm:$0xff] %v341_v35  ;;  %352 = vst [vmem:[%s814_s6 + $0x28] sm:$0xff] %v342_v36  ;;  %v315_v46 = vmul.f32 %v305_v60, %v280_v37  ;;  %v316_v47 = vmul.f32 %v305_v60, %v281_v38 }
 0x171   : > { %349 = vst [vmem:[%s814_s6 + $0x10] sm:$0xff] %v339_v39  ;;  %350 = vst [vmem:[%s814_s6 + $0x18] sm:$0xff] %v340_v40  ;;  %v313_v48 = vmul.f32 %v804_v59, %v278_v43  ;;  %v314_v41 = vmul.f32 %v804_v59, %v279_v44 }
 0x172   : > { %v345_v42 = vadd.f32 %v335_v45, %v315_v46  ;;  %v346_v50 = vadd.f32 %v335_v45, %v316_v47 }
 0x173   : > { %v343_v51 = vadd.f32 %v331_v49, %v313_v48  ;;  %v344_v52 = vadd.f32 %v331_v49, %v314_v41 }
 0x174   : > { %355 = vst [vmem:[%s814_s6 + $0x40] sm:$0xff] %v345_v42  ;;  %356 = vst [vmem:[%s814_s6 + $0x48] sm:$0xff] %v346_v50 }
 0x175   : > { %353 = vst [vmem:[%s814_s6 + $0x30] sm:$0xff] %v343_v51  ;;  %354 = vst [vmem:[%s814_s6 + $0x38] sm:$0xff] %v344_v52 }
 0x176   : > { %583 = shalt.err (!%p580_p0)
}
 0x177   : > { %s584_s29 = scalar_lea.hbm %s833_s16, 1280  ;;  %s588_s19 = scalar_lea.hbm %s884_s2, 2560 }
 0x178   : > { %p585_p2 = scmp.ne.s32.totalorder %s833_s16, %s584_s29  ;;  %p589_p3 = scmp.lt.s32.totalorder %s833_s16, %s884_s2 }
 0x179   : > { %p590_p6 = scmp.lt.s32.totalorder %s588_s19, %s584_s29 }
 0x17a   : > { %p586_p9 = pnand %p585_p2, %p892_p13 }
 0x17b   : > { %p591_p11 = por %p590_p6, %p589_p3 }
 0x17c   : > { %p587_p1 = pneg %p586_p9 }
 0x17e   : > { %p592_p12 = pnand %p591_p11, %p587_p1 }
 0x180   : > { %595 = shalt.err (!%p592_p12)
}
 0x181   : > { %s642_s30 = smov 256   ;;  %s643_s3 = smov 16  }
 0x182   : > { %478 = dma.vmem_to_hbm [thread:$0]  (%p892_p13), %s835_s8, 1280, %s833_s16, %s358_s17, %s642_s30, %s642_s30, %s643_s3  }
 0x183 PF: > { %s387_s6 = sand.u32 1, %s622_s9   ;;  %p893_p4 = scmp.ne.s32.totalorder %s889_s21, 0 }
 0x184   : > { %p894_p5 = scmp.ge.s32.totalorder %s634_s12, 2  ;;  %s388_s7 = scalar_lea.sflag [#allocation4], %s387_s6 }
 0x186   : > { %p485_p7 = pnand %p894_p5, %p893_p4 }
 0x188   : > { %p486_p8 = pneg %p485_p7 }
 0x18a   : > { %617 = dma.done.wait (%p486_p8), %s388_s7, 1280  }
 0x18b   : > { %619 = vsyncadd (%p486_p8), %s388_s7, 4294966016  ;;  %p15_p10 = scmp.ge.s32.totalorder %s684_s15, 4   ;;  %s895_s9 = smov %s626_s10 }
 0x18c   : > { %s896_s10 = smov %s630_s11  ;;  %s897_s11 = smov %s696_s18 }
 0x18d   : > { %s898_s12 = smov %s684_s15  ;;  %17 = sbr.rel (!%p15_p10) target bundleno = 5 (0x5), region = 76 }
 0x192   :  { %393 = vsyncpa [#allocation3], 1 }
 0x193   :  { %395 = vsyncpa [#allocation3 + $0x1], 1 }
 0x194   :  { %396 = vsyncpa [#allocation4], 1 }
 0x195   :  { %398 = vsyncpa [#allocation4 + $0x1], 1 }

</bundles_post_ra>
